<compile_context>
chip_gen: v5e
topology: v5e:2x2
jax: 0.10.0
libtpu: 0.0.40
codegen_flags: <defaults>
</compile_context>

<pallas_src>
import functools
import math

import jax
import jax.numpy as jnp
from jax.experimental import pallas as pl
from jax.experimental.pallas import tpu as pltpu

_LANE = 128
_COL_CANDIDATES = (1024, 512, 256, 128)   # lane-dense widths, largest first


def _cdiv(a: int, b: int) -> int:
    return -(-a // b)


def _round_up(a: int, b: int) -> int:
    return _cdiv(a, b) * b


def _ipow(x, e: int):
    """x ** e for e >= 1 via exponentiation-by-squaring (unrolled at trace time)."""
    result = None
    base = x
    while e > 0:
        if e & 1:
            result = base if result is None else result * base
        e >>= 1
        if e:
            base = base * base
    return result


def _ln_errors_kernel(y_pred_ref, y_true_ref, out_ref, *, n: int):
    diff = y_true_ref[...] - y_pred_ref[...]
    m = abs(n)
    if m == 0:
        # x ** 0 == 1 everywhere (including diff == 0), matching torch.pow.
        res = jnp.ones_like(diff)
    elif m % 2 == 0:
        # Even exponent: |d|**m == (d*d)**(m//2) -> no abs needed.
        res = _ipow(diff * diff, m // 2)
    else:
        res = _ipow(jnp.abs(diff), m)
    if n < 0:
        # Route the divide to the EUP slot instead of a VALU divide sequence.
        res = pl.reciprocal(res, approx=False)
    out_ref[...] = res.astype(out_ref.dtype)


def _ln_errors_jnp(y_pred, y_true, n: int):
    """Fused-XLA fallback (single HBM pass) for tiny or ragged inputs."""
    return jnp.abs(y_true - y_pred) ** n


def _chip_budgets():
    """(per-input block budget bytes, vmem_limit cap bytes) for this chip."""
    try:
        info = pltpu.get_tpu_info()
        vmem_phys = int(getattr(info, "vmem_capacity_bytes", 64 << 20))
    except Exception:  # unknown / no TPU info -> conservative (v7x-safe)
        vmem_phys = 64 << 20
    if vmem_phys >= (96 << 20):
        # v5e / v6e class: 128 MiB physical VMEM.
        return 16 << 20, 100 << 20
    # v7x class (64 MiB physical VMEM) or unknown.
    return 8 << 20, 52 << 20


def ln_errors(y_pred: jax.Array, y_true: jax.Array, n: int = 2,
              *, small_fallback_bytes: int = 1 << 20) -> jax.Array:
    """Pallas TPU implementation of LNErrors.forward: |y_true - y_pred| ** n."""
    assert y_pred.shape == y_true.shape, "broadcasting beyond equal shapes not needed here"
    assert y_pred.dtype == y_true.dtype
    orig_shape = y_pred.shape
    orig_dtype = y_pred.dtype

    if n < 0 and not jnp.issubdtype(jnp.dtype(orig_dtype), jnp.floating):
        # torch.pow raises for negative integer exponents on integer tensors.
        raise ValueError("ln_errors: negative exponent requires floating-point inputs")

    total = math.prod(orig_shape) if orig_shape else 1
    itemsize = jnp.dtype(orig_dtype).itemsize

    # Tiny tensors: the pallas_call fixed cost cannot win; XLA fuses the whole
    # elementwise chain into one pass with zero padding.
    if total * itemsize < small_fallback_bytes or total < _LANE:
        return _ln_errors_jnp(y_pred, y_true, n)

    # ---- Lane-dense 2D view: (rows, cols) with cols dividing total exactly,
    #      so both inputs and the output need NO pad / slice copies. ----
    cols = next((c for c in _COL_CANDIDATES if total % c == 0), None)
    if cols is None:
        # TODO(synk): element counts not divisible by 128 take the fused-XLA
        # path (single HBM pass, no pad/slice copies) instead of an in-kernel
        # ragged-tail masked store.
        return _ln_errors_jnp(y_pred, y_true, n)
    rows = total // cols

    sublane_mult = {1: 32, 2: 16, 4: 8}.get(itemsize, 8)
    block_budget, vmem_cap = _chip_budgets()

    # ---- Row-block sizing by bytes. ----
    t = block_budget // (cols * itemsize)
    t = max(sublane_mult, (t // sublane_mult) * sublane_mult)
    tile_rows = min(t, rows)
    grid_rows = _cdiv(rows, tile_rows)

    # Megacore friendliness (v7x: 2 TensorCores shard the "parallel" axis):
    # guarantee >= 2 grid steps, prefer an even count.  Neutral on v5e/v6e.
    if rows > sublane_mult:
        if grid_rows == 1:
            target = 2
        elif grid_rows % 2 == 1 and tile_rows > sublane_mult:
            target = grid_rows + 1
        else:
            target = grid_rows
        if target != grid_rows:
            tile_rows = min(rows, max(sublane_mult,
                                      _round_up(_cdiv(rows, target), sublane_mult)))
            grid_rows = _cdiv(rows, tile_rows)

    # Pallas masks out-of-bounds writes of the (possibly partial) last block,
    # so rows need not be divisible by tile_rows.
    block_bytes = tile_rows * cols * itemsize
    # 3 operands x 2 pipeline buffers, plus headroom; capped per chip.
    vmem_limit = min(vmem_cap, max(32 << 20, 6 * block_bytes + (4 << 20)))

    yp2 = y_pred.reshape(rows, cols)
    yt2 = y_true.reshape(rows, cols)

    kernel = functools.partial(_ln_errors_kernel, n=n)
    out2 = pl.pallas_call(
        kernel,
        out_shape=jax.ShapeDtypeStruct((rows, cols), orig_dtype),
        grid_spec=pltpu.PrefetchScalarGridSpec(
            num_scalar_prefetch=0,
            grid=(grid_rows,),
            in_specs=[
                pl.BlockSpec((tile_rows, cols), lambda i: (i, 0)),
                pl.BlockSpec((tile_rows, cols), lambda i: (i, 0)),
            ],
            out_specs=pl.BlockSpec((tile_rows, cols), lambda i: (i, 0)),
        ),
        compiler_params=pltpu.CompilerParams(
            dimension_semantics=("parallel",),
            vmem_limit_bytes=vmem_limit,
        ),
    )(yp2, yt2)

    return out2.reshape(orig_shape)


if __name__ == "__main__":
    key = jax.random.PRNGKey(0)
    ks = jax.random.split(key, 8)

    # Case 1: canonical small shape from the module spec, forced through the
    # Pallas kernel (small_fallback_bytes=0) to validate compile + run.
    shape1 = (2, 4, 16, 16)
    y_pred1 = jax.random.normal(ks[0], shape1, dtype=jnp.float32)
    y_true1 = jax.random.normal(ks[1], shape1, dtype=jnp.float32)
    out1 = jax.block_until_ready(ln_errors(y_pred1, y_true1, n=2, small_fallback_bytes=0))
    ref1 = jnp.abs(y_true1 - y_pred1) ** 2
    assert out1.shape == shape1 and out1.dtype == jnp.float32
    assert jnp.allclose(out1, ref1, atol=1e-6, rtol=1e-6), "mismatch vs reference (n=2)"

    # Case 2: larger kernel-path case (default threshold); exercises the
    # divisible-cols selection and the >=2 grid-step megacore split.  Odd n.
    shape2 = (8, 8, 64, 128)   # 524288 elems = 2 MiB f32
    y_pred2 = jax.random.normal(ks[2], shape2, dtype=jnp.float32)
    y_true2 = jax.random.normal(ks[3], shape2, dtype=jnp.float32)
    out2 = jax.block_until_ready(ln_errors(y_pred2, y_true2, n=3))
    ref2 = jnp.abs(y_true2 - y_pred2) ** 3
    assert jnp.allclose(out2, ref2, atol=1e-5, rtol=1e-5), "mismatch vs reference (n=3)"

    # Case 3: negative exponent through the kernel (pl.reciprocal on EUP).
    y_pred3 = jax.random.normal(ks[4], shape2, dtype=jnp.float32)
    y_true3 = y_pred3 + 1.0 + jax.random.uniform(ks[5], shape2, dtype=jnp.float32)  # |diff| >= 1
    out3 = jax.block_until_ready(ln_errors(y_pred3, y_true3, n=-2))
    ref3 = jnp.abs(y_true3 - y_pred3) ** (-2)
    assert jnp.allclose(out3, ref3, atol=1e-5, rtol=1e-5), "mismatch vs reference (n=-2)"

    # Case 4: tiny / ragged shape takes the fused-XLA fallback path.
    shape4 = (3, 5, 7)
    y_pred4 = jax.random.normal(ks[6], shape4, dtype=jnp.float32)
    y_true4 = jax.random.normal(ks[7], shape4, dtype=jnp.float32)
    out4 = jax.block_until_ready(ln_errors(y_pred4, y_true4, n=3))
    ref4 = jnp.abs(y_true4 - y_pred4) ** 3
    assert out4.shape == shape4 and out4.dtype == jnp.float32
    assert jnp.allclose(out4, ref4, atol=1e-6, rtol=1e-6), "mismatch vs reference (ragged n=3)"

    print("KERNEL_OK")
</pallas_src>

<mosaic_0001>
module attributes {stable_mosaic.version = 11 : i64} {
  func.func @_ln_errors_kernel(%arg0: i32, %arg1: memref<2x1024xf32, #tpu.memory_space<vmem>>, %arg2: memref<2x1024xf32, #tpu.memory_space<vmem>>, %arg3: memref<2x1024xf32, #tpu.memory_space<vmem>>) attributes {dimension_semantics = [#tpu.dimension_semantics<parallel>], iteration_bounds = array<i64: 1>, scalar_prefetch = 0 : i64, scratch_operands = 0 : i64, tpu.core_type = #tpu.core_type<tc>, window_params = [{transform_indices = @transform_0, window_bounds = array<i64: 2, 1024>}, {transform_indices = @transform_1, window_bounds = array<i64: 2, 1024>}, {transform_indices = @transform_2, window_bounds = array<i64: 2, 1024>}]} {
    %c0 = arith.constant 0 : index
    %c0_0 = arith.constant 0 : index
    %0 = vector.load %arg2[%c0, %c0_0] : memref<2x1024xf32, #tpu.memory_space<vmem>>, vector<2x1024xf32>
    %c0_1 = arith.constant 0 : index
    %c0_2 = arith.constant 0 : index
    %1 = vector.load %arg1[%c0_1, %c0_2] : memref<2x1024xf32, #tpu.memory_space<vmem>>, vector<2x1024xf32>
    %2 = arith.subf %0, %1 : vector<2x1024xf32>
    %3 = arith.mulf %2, %2 : vector<2x1024xf32>
    %c0_3 = arith.constant 0 : index
    %c0_4 = arith.constant 0 : index
    %4 = vector.load %arg3[%c0_3, %c0_4] : memref<2x1024xf32, #tpu.memory_space<vmem>>, vector<2x1024xf32>
    tpu.vector_store %arg3[%c0_3, %c0_4], %3 {strides = array<i32>} : memref<2x1024xf32, #tpu.memory_space<vmem>>, vector<2x1024xf32>,
    return
  }
  func.func @transform_0(%arg0: i32) -> (i32, i32) {
    %c0_i32 = arith.constant 0 : i32
    %c0_i32_0 = arith.constant 0 : i32
    return %arg0, %c0_i32 : i32, i32
  }
  func.func @transform_1(%arg0: i32) -> (i32, i32) {
    %c0_i32 = arith.constant 0 : i32
    %c0_i32_0 = arith.constant 0 : i32
    return %arg0, %c0_i32 : i32, i32
  }
  func.func @transform_2(%arg0: i32) -> (i32, i32) {
    %c0_i32 = arith.constant 0 : i32
    %c0_i32_0 = arith.constant 0 : i32
    return %arg0, %c0_i32 : i32, i32
  }
}

</mosaic_0001>

<bundles_post_ra>
// kernel: tpu_custom_call.1
= control target key start
LH: loop header
LB: loop body
LE: loop exit
PB: predicated region body
PF: predicated region fallthrough
CT: control target
= control target key end

     0   :  { %7 = vsyncpa [#allocation3], 0  ;;  %s176_s0 = inlined_call_operand.hbm [shape: f32[2,1024], index: 0, kind: input, shape index: {}]   ;;  %s177_s1 = inlined_call_operand.hbm [shape: f32[2,1024], index: 1, kind: input, shape index: {}]   ;;  %s178_s2 = inlined_call_operand.hbm [shape: f32[2,1024], index: 2, kind: output, shape index: {}]  }
   0x1   :  { %8 = vsyncpa [#allocation6], 0 }
   0x2   :  { %9 = vsyncpa [#allocation4], 0  ;;  %s15_s11 = sshll.u32 %s176_s0, 4  ;;  %s149_s12 = smov [#allocation2]   ;;  %s16_s11 = int_to_ptr.hbm [resolvable:$true] %s15_s11 }
   0x3   :  { %s17_s13 = sshll.u32 %s149_s12, 4  ;;  %s26_s16 = sshll.u32 %s177_s1, 4  ;;  %s18_s13 = int_to_ptr.vmem [resolvable:$true] %s17_s13  ;;  %s27_s16 = int_to_ptr.hbm [resolvable:$true] %s26_s16 }
   0x4   :  { %20 = dma.hbm_to_vmem [thread:$0]  %s16_s11, 256, %s18_s13, [#allocation3]  }
   0x5   :  { %s150_s17 = smov [#allocation5]  }
   0x6   :  { %s28_s18 = sshll.u32 %s150_s17, 4  ;;  %s29_s18 = int_to_ptr.vmem [resolvable:$true] %s28_s18 }
   0x7   :  { %31 = dma.hbm_to_vmem [thread:$0]  %s27_s16, 256, %s29_s18, [#allocation6]  }
   0x8   :  { %143 = dma.done.wait [#allocation3], 256  }
   0x9   :  { %144 = vsyncadd [#allocation3], 4294967040 }
   0xa   :  { %145 = dma.done.wait [#allocation6], 256  }
   0xb   :  { %146 = vsyncadd [#allocation6], 4294967040  ;;  %v40_v0 = vld [vmem:[#allocation5] sm:$0xff]  ;;  %v42_v1 = vld [vmem:[#allocation2] sm:$0xff]  ;;  %s151_s0 = smov [#allocation7]   ;;  %s57_s1 = sshll.u32 %s178_s2, 4  ;;  %s58_s1 = int_to_ptr.hbm [resolvable:$true] %s57_s1 }
   0xc   :  { %v41_v2 = vld [vmem:[#allocation5 + $0x8] sm:$0xff]  ;;  %v44_v3 = vsub.f32 %v40_v0, %v42_v1  ;;  %v43_v4 = vld [vmem:[#allocation2 + $0x8] sm:$0xff]  ;;  %s55_s19 = sshll.u32 %s151_s0, 4  ;;  %s56_s19 = int_to_ptr.vmem [resolvable:$true] %s55_s19 }
   0xd   :  { %v45_v5 = vsub.f32 %v41_v2, %v43_v4 }
   0xe   :  { %v46_v6 = vmul.f32 %v44_v3, %v44_v3 }
   0xf   :  { %v47_v7 = vmul.f32 %v45_v5, %v45_v5 }
  0x10   :  { %48 = vst [vmem:[#allocation7] sm:$0xff] %v46_v6 }
  0x11   :  { %49 = vst [vmem:[#allocation7 + $0x8] sm:$0xff] %v47_v7 }
  0x12   :  { %60 = dma.vmem_to_hbm [thread:$0]  %s56_s19, 256, %s58_s1, [#allocation4]  }
  0x13   :  { %147 = dma.done.wait [#allocation4], 256  }
  0x14   :  { %148 = vsyncadd [#allocation4], 4294967040 }
  0x15   :  { %65 = vsyncpa [#allocation3], 1 }
  0x16   :  { %66 = vsyncpa [#allocation6], 1 }
  0x17   :  { %67 = vsyncpa [#allocation4], 1 }

</bundles_post_ra>
